<compile_context>
chip_gen: v7x
topology: tpu7x:2x2x1
jax: 0.10.0
libtpu: 0.0.40
codegen_flags: <defaults>
</compile_context>

<pallas_src>
import jax
import jax.numpy as jnp
from jax.experimental import pallas as pl
from jax.experimental.pallas import tpu as pltpu


def _cdiv(a, b):
    return (a + b - 1) // b


def _hswish_kernel(x_ref, o_ref):
    x = x_ref[...]
    # x * relu6(x + 3) / 6  ==  x * clamp(x + 3, 0, 6) * (1/6)
    r6 = jnp.clip(x + 3.0, 0.0, 6.0)
    o_ref[...] = (x * r6 * (1.0 / 6.0)).astype(o_ref.dtype)


def _hswish_jnp(x):
    return x * jnp.clip(x + 3.0, 0.0, 6.0) * (1.0 / 6.0)


def hswish(x, *, min_pallas_elems=1 << 20, target_block_bytes=8 << 20):
    """Elementwise hard-swish, matching torch: x * F.relu6(x + 3) / 6."""
    orig_shape = x.shape
    dtype = x.dtype
    total = x.size

    if total == 0:
        return x

    # Small/medium activations: an XLA-fused elementwise op beats a custom
    # call (and keeps fusion with producers/consumers).
    if total < min_pallas_elems:
        return _hswish_jnp(x)

    itemsize = jnp.dtype(dtype).itemsize
    # Sublane packing: 8 rows/vreg for 32-bit, 16 for 16-bit, 32 for 8-bit.
    sub = max(8, 32 // max(itemsize, 1))

    # Lane-dense layout: pick the widest multiple-of-128 lane width that
    # divides the problem exactly so no padding copy is needed.
    lane = None
    for cand in (1024, 512, 256, 128):
        if total % cand == 0:
            lane = cand
            break

    flat = x.reshape(-1)
    if lane is None:
        # Rare awkward size: pad by < 1024 elements (hswish(0) == 0 so zeros
        # are a fixed point).
        # TODO(synk): this pad + final slice each cost one extra HBM pass.
        lane = 1024
        padded_total = _cdiv(total, lane) * lane
        flat = jnp.pad(flat, (0, padded_total - total))
    else:
        padded_total = total

    rows = padded_total // lane
    x2 = flat.reshape(rows, lane)

    if rows <= sub:
        # Single block equal to the full first dim (legal even if < 8 rows).
        br = rows
    else:
        # ~target_block_bytes per block, multiple of the sublane packing.
        br = max(sub, (target_block_bytes // (lane * itemsize)) // sub * sub)
        br = min(br, _cdiv(rows, sub) * sub)
        if _cdiv(rows, br) < 2:
            # Keep >= 2 grid steps so a v7x megacore can split the grid
            # across both TensorCores.
            br = max(sub, _cdiv(_cdiv(rows, 2), sub) * sub)

    grid = (_cdiv(rows, br),)            # ragged last block is masked by Pallas
    block_bytes = br * lane * itemsize
    # Double-buffered input + output ~= 4 x block; add headroom, never request
    # the full physical VMEM (64 MiB on v7x).
    vmem_limit = int(min(48 << 20, max(8 << 20, 4 * block_bytes + (4 << 20))))

    cost = pl.CostEstimate(
        flops=5 * total,
        transcendentals=0,
        bytes_accessed=2 * total * itemsize,
    )

    out2 = pl.pallas_call(
        _hswish_kernel,
        out_shape=jax.ShapeDtypeStruct((rows, lane), dtype),
        grid_spec=pltpu.PrefetchScalarGridSpec(
            num_scalar_prefetch=0,
            grid=grid,
            in_specs=[pl.BlockSpec((br, lane), lambda i: (i, 0))],
            out_specs=pl.BlockSpec((br, lane), lambda i: (i, 0)),
        ),
        compiler_params=pltpu.CompilerParams(
            # TODO(synk): on v7x, pltpu.CORE_PARALLEL would force the grid to
            # split across both TensorCores; PARALLEL is the portable choice.
            dimension_semantics=(pltpu.PARALLEL,),
            vmem_limit_bytes=vmem_limit,
        ),
        cost_estimate=cost,
    )(x2)

    out = out2.reshape(-1)
    if padded_total != total:
        out = out[:total]
    return out.reshape(orig_shape)


if __name__ == "__main__":
    key = jax.random.PRNGKey(0)
    k1, k2, k3, k4 = jax.random.split(key, 4)

    def ref(x):
        return x * jnp.clip(x + 3.0, 0.0, 6.0) * (1.0 / 6.0)

    # 1) MobileNet-style activation (2,4,16,16). Default routing -> fused jnp
    #    fallback; also force the Pallas path (single full-array block).
    x1 = jax.random.normal(k1, (2, 4, 16, 16), dtype=jnp.float32) * 4.0
    o_fb = jax.block_until_ready(hswish(x1))
    o_pl = jax.block_until_ready(hswish(x1, min_pallas_elems=0))
    assert o_fb.shape == x1.shape and o_fb.dtype == x1.dtype
    assert o_pl.shape == x1.shape and o_pl.dtype == x1.dtype
    assert jnp.allclose(o_fb, ref(x1), atol=1e-5, rtol=1e-5)
    assert jnp.allclose(o_pl, ref(x1), atol=1e-5, rtol=1e-5)

    # 2) Row count not a multiple of the row tile: exercises the masked
    #    ragged last block (grid=2, no padding copies).
    x2 = jax.random.normal(k2, (2, 3, 64, 64), dtype=jnp.float32) * 4.0
    o2 = jax.block_until_ready(hswish(x2, min_pallas_elems=0))
    assert jnp.allclose(o2, ref(x2), atol=1e-5, rtol=1e-5)

    # 3) Total divisible by 512 but not 1024: exercises the lane-shrink path.
    x3 = jax.random.normal(k3, (2, 4, 16, 12), dtype=jnp.float32) * 4.0
    o3 = jax.block_until_ready(hswish(x3, min_pallas_elems=0))
    assert jnp.allclose(o3, ref(x3), atol=1e-5, rtol=1e-5)

    # 4) bf16: exercises the 16-row sublane packing path.
    x4 = (jax.random.normal(k4, (4, 8, 32, 32), dtype=jnp.float32) * 4.0).astype(
        jnp.bfloat16)
    o4 = jax.block_until_ready(hswish(x4, min_pallas_elems=0))
    assert o4.shape == x4.shape and o4.dtype == jnp.bfloat16
    assert jnp.allclose(o4.astype(jnp.float32), ref(x4.astype(jnp.float32)),
                        atol=2e-1, rtol=2e-2)

    print("KERNEL_OK")
</pallas_src>

<mosaic_0001>
module attributes {stable_mosaic.version = 11 : i64} {
  func.func @_hswish_kernel(%arg0: i32, %arg1: memref<2x1024xf32, #tpu.memory_space<vmem>>, %arg2: memref<2x1024xf32, #tpu.memory_space<vmem>>) attributes {dimension_semantics = [#tpu.dimension_semantics<parallel>], iteration_bounds = array<i64: 1>, scalar_prefetch = 0 : i64, scratch_operands = 0 : i64, tpu.core_type = #tpu.core_type<tc>, window_params = [{transform_indices = @transform_0, window_bounds = array<i64: 2, 1024>}, {transform_indices = @transform_1, window_bounds = array<i64: 2, 1024>}]} {
    %c0 = arith.constant 0 : index
    %c0_0 = arith.constant 0 : index
    %0 = vector.load %arg1[%c0, %c0_0] : memref<2x1024xf32, #tpu.memory_space<vmem>>, vector<2x1024xf32>
    %cst = arith.constant 3.000000e+00 : f32
    %1 = vector.broadcast %cst : f32 to vector<2x1024xf32>
    %2 = arith.addf %0, %1 : vector<2x1024xf32>
    %cst_1 = arith.constant 0.000000e+00 : f32
    %cst_2 = arith.constant 6.000000e+00 : f32
    %3 = vector.broadcast %cst_1 : f32 to vector<2x1024xf32>
    %4 = arith.maximumf %3, %2 : vector<2x1024xf32>
    %5 = vector.broadcast %cst_2 : f32 to vector<2x1024xf32>
    %6 = arith.minimumf %5, %4 : vector<2x1024xf32>
    %7 = arith.mulf %0, %6 : vector<2x1024xf32>
    %cst_3 = arith.constant 0.166666672 : f32
    %8 = vector.broadcast %cst_3 : f32 to vector<2x1024xf32>
    %9 = arith.mulf %7, %8 : vector<2x1024xf32>
    %c0_4 = arith.constant 0 : index
    %c0_5 = arith.constant 0 : index
    %10 = vector.load %arg2[%c0_4, %c0_5] : memref<2x1024xf32, #tpu.memory_space<vmem>>, vector<2x1024xf32>
    tpu.vector_store %arg2[%c0_4, %c0_5], %9 {strides = array<i32>} : memref<2x1024xf32, #tpu.memory_space<vmem>>, vector<2x1024xf32>,
    return
  }
  func.func @transform_0(%arg0: i32) -> (i32, i32) {
    %c0_i32 = arith.constant 0 : i32
    %c0_i32_0 = arith.constant 0 : i32
    return %arg0, %c0_i32 : i32, i32
  }
  func.func @transform_1(%arg0: i32) -> (i32, i32) {
    %c0_i32 = arith.constant 0 : i32
    %c0_i32_0 = arith.constant 0 : i32
    return %arg0, %c0_i32 : i32, i32
  }
}

</mosaic_0001>

<bundles_post_ra>
// kernel: tpu_custom_call.1
= control target key start
LH: loop header
LB: loop body
LE: loop exit
PB: predicated region body
PF: predicated region fallthrough
CT: control target
= control target key end

     0   :  { %6 = vsyncpa [#allocation3], 0  ;;  %s136_s0 = inlined_call_operand.hbm [shape: f32[2,1024], index: 0, kind: input, shape index: {}]   ;;  %s137_s1 = inlined_call_operand.hbm [shape: f32[2,1024], index: 1, kind: output, shape index: {}]  }
   0x1   :  { %7 = vsyncpa [#allocation4], 0  ;;  %s100_s6 = smov [#allocation2]   ;;  %s52_s10 = scalar_lea.hbm %s136_s0, 256 }
   0x2   :  { %s14_s7 = sshll.u32 %s100_s6, 4  ;;  %p53_p0 = scmp.ne.s32.totalorder %s136_s0, %s52_s10  ;;  %s15_s7 = int_to_ptr.vmem [resolvable:$true] %s14_s7 }
   0x3   :  { %p56_p1 = scmp.lt.u32.totalorder %s52_s10, %s136_s0 }
   0x5   :  { %p58_p2 = pnand %p56_p1, %p53_p0 }
   0x7   :  { %61 = shalt.err (!%p58_p2)
}
   0x8   :  { %s62_s15 = scalar_lea.vmem %s15_s7, 256  ;;  %p67_p4 = scmp.lt.s32.totalorder %s15_s7, %s15_s7 }
   0x9   :  { %p63_p3 = scmp.ne.s32.totalorder %s15_s7, %s62_s15  ;;  %p68_p5 = scmp.lt.s32.totalorder %s62_s15, %s62_s15 }
   0xb   :  { %p69_p6 = por %p68_p5, %p67_p4 }
   0xd   :  { %p70_p7 = pnand %p69_p6, %p63_p3 }
   0xf   :  { %73 = shalt.err (!%p70_p7)
}
  0x10   :  { %17 = dma.hbm_to_vmem [thread:$0]  %s136_s0, 256, %s15_s7, [#allocation3]  }
  0x11   :  { %96 = dma.done.wait [#allocation3], 256  }
  0x12   :  { %97 = vsyncadd [#allocation3], 4294967040  ;;  %v21_v0 = vld [vmem:[#allocation2] sm:$0xff]  ;;  %v22_v1 = vld [vmem:[#allocation2 + $0x8] sm:$0xff]  ;;  %s101_s18 = smov [#allocation5]  }
  0x13   :  { %v23_v2 = vadd.f32 3.0, %v21_v0  ;;  %v24_v3 = vadd.f32 3.0, %v22_v1  ;;  %s41_s19 = sshll.u32 %s101_s18, 4  ;;  %s42_s19 = int_to_ptr.vmem [resolvable:$true] %s41_s19 }
  0x14   :  { %s74_s0 = scalar_lea.vmem %s42_s19, 256  ;;  %p79_p9 = scmp.lt.s32.totalorder %s42_s19, %s42_s19 }
  0x15   :  { %v25_v4 = vmax.f32 %v23_v2, 0.0  ;;  %v26_v5 = vmax.f32 %v24_v3, 0.0  ;;  %p75_p8 = scmp.ne.s32.totalorder %s42_s19, %s74_s0  ;;  %p80_p10 = scmp.lt.s32.totalorder %s74_s0, %s74_s0 }
  0x17   :  { %v27_v6 = vmin.f32 %v25_v4, 6.0  ;;  %v28_v7 = vmin.f32 %v26_v5, 6.0  ;;  %p81_p11 = por %p80_p10, %p79_p9 }
  0x19   :  { %v29_v8 = vmul.f32 %v27_v6, %v21_v0  ;;  %v30_v9 = vmul.f32 %v28_v7, %v22_v1  ;;  %p82_p12 = pnand %p81_p11, %p75_p8 }
  0x1b   :  { %v31_v10 = vmul.f32 0.16666667, %v29_v8  ;;  %v32_v11 = vmul.f32 0.16666667, %v30_v9 }
  0x1d   :  { %33 = vst [vmem:[#allocation5] sm:$0xff] %v31_v10  ;;  %34 = vst [vmem:[#allocation5 + $0x8] sm:$0xff] %v32_v11 }
  0x1e   :  { %85 = shalt.err (!%p82_p12)
}
  0x1f   :  { %s86_s22 = scalar_lea.hbm %s137_s1, 256 }
  0x20   :  { %p87_p13 = scmp.ne.s32.totalorder %s137_s1, %s86_s22  ;;  %p90_p0 = scmp.lt.u32.totalorder %s86_s22, %s137_s1 }
  0x22   :  { %p92_p1 = pnand %p90_p0, %p87_p13 }
  0x24   :  { %95 = shalt.err (!%p92_p1)
}
  0x25   :  { %44 = dma.vmem_to_hbm [thread:$0]  %s42_s19, 256, %s137_s1, [#allocation4]  }
  0x26   :  { %98 = dma.done.wait [#allocation4], 256  }
  0x27   :  { %99 = vsyncadd [#allocation4], 4294967040 }
  0x28   :  { %48 = vsyncpa [#allocation3], 1 }
  0x29   :  { %49 = vsyncpa [#allocation4], 1 }

</bundles_post_ra>
